<compile_context>
chip_gen: v7x
topology: tpu7x:2x2x1
jax: 0.10.0
libtpu: 0.0.40
codegen_flags: <defaults>
</compile_context>

<pallas_src>
import jax
import jax.numpy as jnp
from jax.experimental import pallas as pl
from jax.experimental.pallas import tpu as pltpu


def _pick_hb(H, W, Cin, Cout, budget_bytes=8 * 1024 * 1024):
    """Largest row-band Hb that divides H, is (8,128)-layout legal, fits the budget."""
    # Per input row: Cin*W f32 in + Cout*4W f32 out, x2 for double buffering.
    row_bytes = 4 * (Cin * W + 4 * Cout * W) * 2
    max_rows = max(1, budget_bytes // row_bytes)
    for hb in range(min(H, max_rows), 0, -1):
        if H % hb == 0 and (hb == H or hb % 8 == 0):
            return hb
    return H  # whole image: full-dim blocks are always layout-legal


def _make_kernel(Cin, Cout, Hb, W):
    def kernel(scale_ref, shift_ref, w_ref, x_ref, up_ref, o_ref):
        # scale_ref/shift_ref : SMEM (Cin,)        folded BatchNorm(eval) scale / shift
        # w_ref               : SMEM (Cin*Cout,)   ConvTranspose2d weight, w[i*Cout+o]
        # x_ref               : VMEM (1, Cin, Hb, W)      NCHW input row-band
        # up_ref              : VMEM (W, 4W)              [DW | DW], DW[w, 2w+dw] = 1
        # o_ref               : VMEM (1, Cout, Hb, 4W)    lanes packed as (dh, w, dw)
        up = up_ref[...]

        # BatchNorm (inference) + ReLU, per input channel (scalar * tile on the VPU).
        ys = []
        for i in range(Cin):
            xi = x_ref[0, i]                                        # (Hb, W)
            ys.append(jnp.maximum(xi * scale_ref[i] + shift_ref[i], 0.0))

        # 1x1 transposed conv (per-pixel channel mix) + 2x nearest upsample.
        for o in range(Cout):
            z = ys[0] * w_ref[o]
            for i in range(1, Cin):
                z = z + ys[i] * w_ref[i * Cout + o]                 # (Hb, W)
            # One MXU matmul emits the 2x-upsampled rows already packed as
            # (dh, w, dw) along the lane axis -> single dense store per channel.
            o_ref[0, o] = jnp.dot(
                z, up, preferred_element_type=jnp.float32).astype(o_ref.dtype)

    return kernel


def transition_block(x_nchw, weight, gamma, beta, running_mean, running_var,
                     eps=1e-5, drop_rate=0.0):
    """Pallas TransitionBlock forward. x_nchw: (N, Cin, H, W) -> (N, Cout, 2H, 2W)."""
    if drop_rate > 0.0:
        # TODO(synk): F.dropout path not implemented (module default dropRate=0.0).
        raise NotImplementedError("drop_rate > 0 is not supported by this kernel")

    N, Cin, H, W = x_nchw.shape
    Cout = weight.shape[1]

    x = x_nchw.astype(jnp.float32)

    # Fold BatchNorm (inference / running stats) into per-channel scale & shift.
    inv_std = jax.lax.rsqrt(running_var.astype(jnp.float32) + eps)
    scale = gamma.astype(jnp.float32) * inv_std                            # (Cin,)
    shift = beta.astype(jnp.float32) - running_mean.astype(jnp.float32) * scale
    w_flat = weight.astype(jnp.float32).reshape(Cin * Cout)                # w[i*Cout+o]

    # Constant 0/1 upsample matrix, columns ordered (dh, w, dw): z @ up duplicates every
    # pixel of a (Hb, W) tile into its 2x2 nearest-neighbour footprint in one matmul.
    dup_w = jnp.repeat(jnp.eye(W, dtype=jnp.float32), 2, axis=1)           # (W, 2W)
    up = jnp.concatenate([dup_w, dup_w], axis=1)                           # (W, 4W)

    Hb = _pick_hb(H, W, Cin, Cout)
    grid = (N, H // Hb)

    out = pl.pallas_call(
        _make_kernel(Cin, Cout, Hb, W),
        out_shape=jax.ShapeDtypeStruct((N, Cout, H, 4 * W), jnp.float32),
        grid_spec=pltpu.PrefetchScalarGridSpec(
            num_scalar_prefetch=3,                  # scale, shift, w_flat -> SMEM, once
            grid=grid,
            in_specs=[
                pl.BlockSpec((1, Cin, Hb, W), lambda n, hb, *_: (n, 0, hb, 0)),
                pl.BlockSpec((W, 4 * W), lambda n, hb, *_: (0, 0)),
            ],
            out_specs=pl.BlockSpec((1, Cout, Hb, 4 * W),
                                   lambda n, hb, *_: (n, 0, hb, 0)),
        ),
        compiler_params=pltpu.CompilerParams(
            dimension_semantics=("parallel", "parallel")),
    )(scale, shift, w_flat, x, up)

    # (N, Cout, H, [dh, w, dw]) -> (N, Cout, 2H, 2W): a free, contiguous reshape.
    return out.reshape(N, Cout, 2 * H, 2 * W)


def _reference(x_nchw, weight, gamma, beta, running_mean, running_var, eps=1e-5):
    """Pure-JAX reference of the PyTorch forward (eval mode, dropRate=0)."""
    xn = (x_nchw - running_mean[None, :, None, None]) * \
         jax.lax.rsqrt(running_var + eps)[None, :, None, None]
    xn = xn * gamma[None, :, None, None] + beta[None, :, None, None]
    xr = jnp.maximum(xn, 0.0)
    # ConvTranspose2d, kernel=1, stride=1, pad=0, no bias: out[o] = sum_i x[i] * W[i, o]
    y = jnp.einsum('nihw,io->nohw', xr, weight)
    y = jnp.repeat(jnp.repeat(y, 2, axis=2), 2, axis=3)   # nearest upsample x2
    return y


if __name__ == "__main__":
    key = jax.random.PRNGKey(0)
    k_x, k_w, k_g, k_b, k_m, k_v = jax.random.split(key, 6)

    N, Cin, H, W = 2, 4, 16, 16     # in_planes = 4
    Cout = 8                        # out_planes = 8

    x = jax.random.normal(k_x, (N, Cin, H, W), dtype=jnp.float32)

    # ConvTranspose2d weight has PyTorch shape (in_planes, out_planes, 1, 1);
    # we keep the squeezed (Cin, Cout) matrix.
    weight = jax.random.normal(k_w, (Cin, Cout), dtype=jnp.float32) * 0.1
    gamma = 1.0 + 0.1 * jax.random.normal(k_g, (Cin,), dtype=jnp.float32)
    beta = 0.1 * jax.random.normal(k_b, (Cin,), dtype=jnp.float32)
    running_mean = 0.1 * jax.random.normal(k_m, (Cin,), dtype=jnp.float32)
    running_var = jnp.abs(jax.random.normal(k_v, (Cin,), dtype=jnp.float32)) + 0.5

    out = transition_block(x, weight, gamma, beta, running_mean, running_var)
    out = jax.block_until_ready(out)

    ref = _reference(x, weight, gamma, beta, running_mean, running_var)
    assert out.shape == (N, Cout, 2 * H, 2 * W), out.shape
    assert jnp.allclose(out, ref, rtol=1e-5, atol=1e-5), \
        float(jnp.max(jnp.abs(out - ref)))

    print("KERNEL_OK")
</pallas_src>

<mosaic_0001>
module attributes {stable_mosaic.version = 11 : i64} {
  func.func @kernel(%arg0: i32, %arg1: i32, %arg2: memref<4xf32, #tpu.memory_space<smem>>, %arg3: memref<4xf32, #tpu.memory_space<smem>>, %arg4: memref<32xf32, #tpu.memory_space<smem>>, %arg5: memref<1x4x16x16xf32, #tpu.memory_space<vmem>>, %arg6: memref<16x64xf32, #tpu.memory_space<vmem>>, %arg7: memref<1x8x16x64xf32, #tpu.memory_space<vmem>>) attributes {dimension_semantics = [#tpu.dimension_semantics<parallel>, #tpu.dimension_semantics<parallel>], iteration_bounds = array<i64: 2, 1>, scalar_prefetch = 3 : i64, scratch_operands = 0 : i64, tpu.core_type = #tpu.core_type<tc>, window_params = [{transform_indices = @transform_0, window_bounds = array<i64: 1, 4, 16, 16>}, {pipeline_mode = #tpu.pipeline_mode<synchronous>, transform_indices = @transform_1, window_bounds = array<i64: 16, 64>}, {transform_indices = @transform_2, window_bounds = array<i64: 1, 8, 16, 64>}]} {
    %c0 = arith.constant 0 : index
    %c0_0 = arith.constant 0 : index
    %0 = vector.load %arg6[%c0, %c0_0] : memref<16x64xf32, #tpu.memory_space<vmem>>, vector<16x64xf32>
    %c0_1 = arith.constant 0 : index
    %c0_2 = arith.constant 0 : index
    %c0_3 = arith.constant 0 : index
    %c0_4 = arith.constant 0 : index
    %1 = vector.load %arg5[%c0_1, %c0_2, %c0_3, %c0_4] : memref<1x4x16x16xf32, #tpu.memory_space<vmem>>, vector<1x1x16x16xf32>
    %2 = vector.shape_cast %1 : vector<1x1x16x16xf32> to vector<16x16xf32>
    %c0_5 = arith.constant 0 : index
    %3 = memref.load %arg2[%c0_5] : memref<4xf32, #tpu.memory_space<smem>>
    %4 = vector.broadcast %3 : f32 to vector<16x16xf32>
    %5 = arith.mulf %2, %4 : vector<16x16xf32>
    %c0_6 = arith.constant 0 : index
    %6 = memref.load %arg3[%c0_6] : memref<4xf32, #tpu.memory_space<smem>>
    %7 = vector.broadcast %6 : f32 to vector<16x16xf32>
    %8 = arith.addf %5, %7 : vector<16x16xf32>
    %cst = arith.constant 0.000000e+00 : f32
    %9 = vector.broadcast %cst : f32 to vector<16x16xf32>
    %10 = arith.maximumf %8, %9 : vector<16x16xf32>
    %c0_7 = arith.constant 0 : index
    %c1 = arith.constant 1 : index
    %c0_8 = arith.constant 0 : index
    %c0_9 = arith.constant 0 : index
    %11 = vector.load %arg5[%c0_7, %c1, %c0_8, %c0_9] : memref<1x4x16x16xf32, #tpu.memory_space<vmem>>, vector<1x1x16x16xf32>
    %12 = vector.shape_cast %11 : vector<1x1x16x16xf32> to vector<16x16xf32>
    %c1_10 = arith.constant 1 : index
    %13 = memref.load %arg2[%c1_10] : memref<4xf32, #tpu.memory_space<smem>>
    %14 = vector.broadcast %13 : f32 to vector<16x16xf32>
    %15 = arith.mulf %12, %14 : vector<16x16xf32>
    %c1_11 = arith.constant 1 : index
    %16 = memref.load %arg3[%c1_11] : memref<4xf32, #tpu.memory_space<smem>>
    %17 = vector.broadcast %16 : f32 to vector<16x16xf32>
    %18 = arith.addf %15, %17 : vector<16x16xf32>
    %cst_12 = arith.constant 0.000000e+00 : f32
    %19 = vector.broadcast %cst_12 : f32 to vector<16x16xf32>
    %20 = arith.maximumf %18, %19 : vector<16x16xf32>
    %c0_13 = arith.constant 0 : index
    %c2 = arith.constant 2 : index
    %c0_14 = arith.constant 0 : index
    %c0_15 = arith.constant 0 : index
    %21 = vector.load %arg5[%c0_13, %c2, %c0_14, %c0_15] : memref<1x4x16x16xf32, #tpu.memory_space<vmem>>, vector<1x1x16x16xf32>
    %22 = vector.shape_cast %21 : vector<1x1x16x16xf32> to vector<16x16xf32>
    %c2_16 = arith.constant 2 : index
    %23 = memref.load %arg2[%c2_16] : memref<4xf32, #tpu.memory_space<smem>>
    %24 = vector.broadcast %23 : f32 to vector<16x16xf32>
    %25 = arith.mulf %22, %24 : vector<16x16xf32>
    %c2_17 = arith.constant 2 : index
    %26 = memref.load %arg3[%c2_17] : memref<4xf32, #tpu.memory_space<smem>>
    %27 = vector.broadcast %26 : f32 to vector<16x16xf32>
    %28 = arith.addf %25, %27 : vector<16x16xf32>
    %cst_18 = arith.constant 0.000000e+00 : f32
    %29 = vector.broadcast %cst_18 : f32 to vector<16x16xf32>
    %30 = arith.maximumf %28, %29 : vector<16x16xf32>
    %c0_19 = arith.constant 0 : index
    %c3 = arith.constant 3 : index
    %c0_20 = arith.constant 0 : index
    %c0_21 = arith.constant 0 : index
    %31 = vector.load %arg5[%c0_19, %c3, %c0_20, %c0_21] : memref<1x4x16x16xf32, #tpu.memory_space<vmem>>, vector<1x1x16x16xf32>
    %32 = vector.shape_cast %31 : vector<1x1x16x16xf32> to vector<16x16xf32>
    %c3_22 = arith.constant 3 : index
    %33 = memref.load %arg2[%c3_22] : memref<4xf32, #tpu.memory_space<smem>>
    %34 = vector.broadcast %33 : f32 to vector<16x16xf32>
    %35 = arith.mulf %32, %34 : vector<16x16xf32>
    %c3_23 = arith.constant 3 : index
    %36 = memref.load %arg3[%c3_23] : memref<4xf32, #tpu.memory_space<smem>>
    %37 = vector.broadcast %36 : f32 to vector<16x16xf32>
    %38 = arith.addf %35, %37 : vector<16x16xf32>
    %cst_24 = arith.constant 0.000000e+00 : f32
    %39 = vector.broadcast %cst_24 : f32 to vector<16x16xf32>
    %40 = arith.maximumf %38, %39 : vector<16x16xf32>
    %c0_25 = arith.constant 0 : index
    %41 = memref.load %arg4[%c0_25] : memref<32xf32, #tpu.memory_space<smem>>
    %42 = vector.broadcast %41 : f32 to vector<16x16xf32>
    %43 = arith.mulf %10, %42 : vector<16x16xf32>
    %c8 = arith.constant 8 : index
    %44 = memref.load %arg4[%c8] : memref<32xf32, #tpu.memory_space<smem>>
    %45 = vector.broadcast %44 : f32 to vector<16x16xf32>
    %46 = arith.mulf %20, %45 : vector<16x16xf32>
    %47 = arith.addf %43, %46 : vector<16x16xf32>
    %c16 = arith.constant 16 : index
    %48 = memref.load %arg4[%c16] : memref<32xf32, #tpu.memory_space<smem>>
    %49 = vector.broadcast %48 : f32 to vector<16x16xf32>
    %50 = arith.mulf %30, %49 : vector<16x16xf32>
    %51 = arith.addf %47, %50 : vector<16x16xf32>
    %c24 = arith.constant 24 : index
    %52 = memref.load %arg4[%c24] : memref<32xf32, #tpu.memory_space<smem>>
    %53 = vector.broadcast %52 : f32 to vector<16x16xf32>
    %54 = arith.mulf %40, %53 : vector<16x16xf32>
    %55 = arith.addf %51, %54 : vector<16x16xf32>
    %cst_26 = arith.constant dense<0.000000e+00> : vector<16x64xf32>
    %56 = tpu.matmul %55, %0, %cst_26 {dimension_numbers = #tpu.dot_dimension_numbers<[1], [0], [0], [1], [0, 0, 1, 1], [], []>} : vector<16x16xf32>, vector<16x64xf32>, vector<16x64xf32> -> vector<16x64xf32>
    %c0_27 = arith.constant 0 : index
    %c0_28 = arith.constant 0 : index
    %c0_29 = arith.constant 0 : index
    %c0_30 = arith.constant 0 : index
    %57 = vector.load %arg7[%c0_27, %c0_28, %c0_29, %c0_30] : memref<1x8x16x64xf32, #tpu.memory_space<vmem>>, vector<1x1x16x64xf32>
    %58 = vector.shape_cast %57 : vector<1x1x16x64xf32> to vector<16x64xf32>
    %59 = vector.shape_cast %56 : vector<16x64xf32> to vector<1x1x16x64xf32>
    tpu.vector_store %arg7[%c0_27, %c0_28, %c0_29, %c0_30], %59 {strides = array<i32>} : memref<1x8x16x64xf32, #tpu.memory_space<vmem>>, vector<1x1x16x64xf32>,
    %c1_31 = arith.constant 1 : index
    %60 = memref.load %arg4[%c1_31] : memref<32xf32, #tpu.memory_space<smem>>
    %61 = vector.broadcast %60 : f32 to vector<16x16xf32>
    %62 = arith.mulf %10, %61 : vector<16x16xf32>
    %c9 = arith.constant 9 : index
    %63 = memref.load %arg4[%c9] : memref<32xf32, #tpu.memory_space<smem>>
    %64 = vector.broadcast %63 : f32 to vector<16x16xf32>
    %65 = arith.mulf %20, %64 : vector<16x16xf32>
    %66 = arith.addf %62, %65 : vector<16x16xf32>
    %c17 = arith.constant 17 : index
    %67 = memref.load %arg4[%c17] : memref<32xf32, #tpu.memory_space<smem>>
    %68 = vector.broadcast %67 : f32 to vector<16x16xf32>
    %69 = arith.mulf %30, %68 : vector<16x16xf32>
    %70 = arith.addf %66, %69 : vector<16x16xf32>
    %c25 = arith.constant 25 : index
    %71 = memref.load %arg4[%c25] : memref<32xf32, #tpu.memory_space<smem>>
    %72 = vector.broadcast %71 : f32 to vector<16x16xf32>
    %73 = arith.mulf %40, %72 : vector<16x16xf32>
    %74 = arith.addf %70, %73 : vector<16x16xf32>
    %cst_32 = arith.constant dense<0.000000e+00> : vector<16x64xf32>
    %75 = tpu.matmul %74, %0, %cst_32 {dimension_numbers = #tpu.dot_dimension_numbers<[1], [0], [0], [1], [0, 0, 1, 1], [], []>} : vector<16x16xf32>, vector<16x64xf32>, vector<16x64xf32> -> vector<16x64xf32>
    %c0_33 = arith.constant 0 : index
    %c1_34 = arith.constant 1 : index
    %c0_35 = arith.constant 0 : index
    %c0_36 = arith.constant 0 : index
    %76 = vector.load %arg7[%c0_33, %c1_34, %c0_35, %c0_36] : memref<1x8x16x64xf32, #tpu.memory_space<vmem>>, vector<1x1x16x64xf32>
    %77 = vector.shape_cast %76 : vector<1x1x16x64xf32> to vector<16x64xf32>
    %78 = vector.shape_cast %75 : vector<16x64xf32> to vector<1x1x16x64xf32>
    tpu.vector_store %arg7[%c0_33, %c1_34, %c0_35, %c0_36], %78 {strides = array<i32>} : memref<1x8x16x64xf32, #tpu.memory_space<vmem>>, vector<1x1x16x64xf32>,
    %c2_37 = arith.constant 2 : index
    %79 = memref.load %arg4[%c2_37] : memref<32xf32, #tpu.memory_space<smem>>
    %80 = vector.broadcast %79 : f32 to vector<16x16xf32>
    %81 = arith.mulf %10, %80 : vector<16x16xf32>
    %c10 = arith.constant 10 : index
    %82 = memref.load %arg4[%c10] : memref<32xf32, #tpu.memory_space<smem>>
    %83 = vector.broadcast %82 : f32 to vector<16x16xf32>
    %84 = arith.mulf %20, %83 : vector<16x16xf32>
    %85 = arith.addf %81, %84 : vector<16x16xf32>
    %c18 = arith.constant 18 : index
    %86 = memref.load %arg4[%c18] : memref<32xf32, #tpu.memory_space<smem>>
    %87 = vector.broadcast %86 : f32 to vector<16x16xf32>
    %88 = arith.mulf %30, %87 : vector<16x16xf32>
    %89 = arith.addf %85, %88 : vector<16x16xf32>
    %c26 = arith.constant 26 : index
    %90 = memref.load %arg4[%c26] : memref<32xf32, #tpu.memory_space<smem>>
    %91 = vector.broadcast %90 : f32 to vector<16x16xf32>
    %92 = arith.mulf %40, %91 : vector<16x16xf32>
    %93 = arith.addf %89, %92 : vector<16x16xf32>
    %cst_38 = arith.constant dense<0.000000e+00> : vector<16x64xf32>
    %94 = tpu.matmul %93, %0, %cst_38 {dimension_numbers = #tpu.dot_dimension_numbers<[1], [0], [0], [1], [0, 0, 1, 1], [], []>} : vector<16x16xf32>, vector<16x64xf32>, vector<16x64xf32> -> vector<16x64xf32>
    %c0_39 = arith.constant 0 : index
    %c2_40 = arith.constant 2 : index
    %c0_41 = arith.constant 0 : index
    %c0_42 = arith.constant 0 : index
    %95 = vector.load %arg7[%c0_39, %c2_40, %c0_41, %c0_42] : memref<1x8x16x64xf32, #tpu.memory_space<vmem>>, vector<1x1x16x64xf32>
    %96 = vector.shape_cast %95 : vector<1x1x16x64xf32> to vector<16x64xf32>
    %97 = vector.shape_cast %94 : vector<16x64xf32> to vector<1x1x16x64xf32>
    tpu.vector_store %arg7[%c0_39, %c2_40, %c0_41, %c0_42], %97 {strides = array<i32>} : memref<1x8x16x64xf32, #tpu.memory_space<vmem>>, vector<1x1x16x64xf32>,
    %c3_43 = arith.constant 3 : index
    %98 = memref.load %arg4[%c3_43] : memref<32xf32, #tpu.memory_space<smem>>
    %99 = vector.broadcast %98 : f32 to vector<16x16xf32>
    %100 = arith.mulf %10, %99 : vector<16x16xf32>
    %c11 = arith.constant 11 : index
    %101 = memref.load %arg4[%c11] : memref<32xf32, #tpu.memory_space<smem>>
    %102 = vector.broadcast %101 : f32 to vector<16x16xf32>
    %103 = arith.mulf %20, %102 : vector<16x16xf32>
    %104 = arith.addf %100, %103 : vector<16x16xf32>
    %c19 = arith.constant 19 : index
    %105 = memref.load %arg4[%c19] : memref<32xf32, #tpu.memory_space<smem>>
    %106 = vector.broadcast %105 : f32 to vector<16x16xf32>
    %107 = arith.mulf %30, %106 : vector<16x16xf32>
    %108 = arith.addf %104, %107 : vector<16x16xf32>
    %c27 = arith.constant 27 : index
    %109 = memref.load %arg4[%c27] : memref<32xf32, #tpu.memory_space<smem>>
    %110 = vector.broadcast %109 : f32 to vector<16x16xf32>
    %111 = arith.mulf %40, %110 : vector<16x16xf32>
    %112 = arith.addf %108, %111 : vector<16x16xf32>
    %cst_44 = arith.constant dense<0.000000e+00> : vector<16x64xf32>
    %113 = tpu.matmul %112, %0, %cst_44 {dimension_numbers = #tpu.dot_dimension_numbers<[1], [0], [0], [1], [0, 0, 1, 1], [], []>} : vector<16x16xf32>, vector<16x64xf32>, vector<16x64xf32> -> vector<16x64xf32>
    %c0_45 = arith.constant 0 : index
    %c3_46 = arith.constant 3 : index
    %c0_47 = arith.constant 0 : index
    %c0_48 = arith.constant 0 : index
    %114 = vector.load %arg7[%c0_45, %c3_46, %c0_47, %c0_48] : memref<1x8x16x64xf32, #tpu.memory_space<vmem>>, vector<1x1x16x64xf32>
    %115 = vector.shape_cast %114 : vector<1x1x16x64xf32> to vector<16x64xf32>
    %116 = vector.shape_cast %113 : vector<16x64xf32> to vector<1x1x16x64xf32>
    tpu.vector_store %arg7[%c0_45, %c3_46, %c0_47, %c0_48], %116 {strides = array<i32>} : memref<1x8x16x64xf32, #tpu.memory_space<vmem>>, vector<1x1x16x64xf32>,
    %c4 = arith.constant 4 : index
    %117 = memref.load %arg4[%c4] : memref<32xf32, #tpu.memory_space<smem>>
    %118 = vector.broadcast %117 : f32 to vector<16x16xf32>
    %119 = arith.mulf %10, %118 : vector<16x16xf32>
    %c12 = arith.constant 12 : index
    %120 = memref.load %arg4[%c12] : memref<32xf32, #tpu.memory_space<smem>>
    %121 = vector.broadcast %120 : f32 to vector<16x16xf32>
    %122 = arith.mulf %20, %121 : vector<16x16xf32>
    %123 = arith.addf %119, %122 : vector<16x16xf32>
    %c20 = arith.constant 20 : index
    %124 = memref.load %arg4[%c20] : memref<32xf32, #tpu.memory_space<smem>>
    %125 = vector.broadcast %124 : f32 to vector<16x16xf32>
    %126 = arith.mulf %30, %125 : vector<16x16xf32>
    %127 = arith.addf %123, %126 : vector<16x16xf32>
    %c28 = arith.constant 28 : index
    %128 = memref.load %arg4[%c28] : memref<32xf32, #tpu.memory_space<smem>>
    %129 = vector.broadcast %128 : f32 to vector<16x16xf32>
    %130 = arith.mulf %40, %129 : vector<16x16xf32>
    %131 = arith.addf %127, %130 : vector<16x16xf32>
    %cst_49 = arith.constant dense<0.000000e+00> : vector<16x64xf32>
    %132 = tpu.matmul %131, %0, %cst_49 {dimension_numbers = #tpu.dot_dimension_numbers<[1], [0], [0], [1], [0, 0, 1, 1], [], []>} : vector<16x16xf32>, vector<16x64xf32>, vector<16x64xf32> -> vector<16x64xf32>
    %c0_50 = arith.constant 0 : index
    %c4_51 = arith.constant 4 : index
    %c0_52 = arith.constant 0 : index
    %c0_53 = arith.constant 0 : index
    %133 = vector.load %arg7[%c0_50, %c4_51, %c0_52, %c0_53] : memref<1x8x16x64xf32, #tpu.memory_space<vmem>>, vector<1x1x16x64xf32>
    %134 = vector.shape_cast %133 : vector<1x1x16x64xf32> to vector<16x64xf32>
    %135 = vector.shape_cast %132 : vector<16x64xf32> to vector<1x1x16x64xf32>
    tpu.vector_store %arg7[%c0_50, %c4_51, %c0_52, %c0_53], %135 {strides = array<i32>} : memref<1x8x16x64xf32, #tpu.memory_space<vmem>>, vector<1x1x16x64xf32>,
    %c5 = arith.constant 5 : index
    %136 = memref.load %arg4[%c5] : memref<32xf32, #tpu.memory_space<smem>>
    %137 = vector.broadcast %136 : f32 to vector<16x16xf32>
    %138 = arith.mulf %10, %137 : vector<16x16xf32>
    %c13 = arith.constant 13 : index
    %139 = memref.load %arg4[%c13] : memref<32xf32, #tpu.memory_space<smem>>
    %140 = vector.broadcast %139 : f32 to vector<16x16xf32>
    %141 = arith.mulf %20, %140 : vector<16x16xf32>
    %142 = arith.addf %138, %141 : vector<16x16xf32>
    %c21 = arith.constant 21 : index
    %143 = memref.load %arg4[%c21] : memref<32xf32, #tpu.memory_space<smem>>
    %144 = vector.broadcast %143 : f32 to vector<16x16xf32>
    %145 = arith.mulf %30, %144 : vector<16x16xf32>
    %146 = arith.addf %142, %145 : vector<16x16xf32>
    %c29 = arith.constant 29 : index
    %147 = memref.load %arg4[%c29] : memref<32xf32, #tpu.memory_space<smem>>
    %148 = vector.broadcast %147 : f32 to vector<16x16xf32>
    %149 = arith.mulf %40, %148 : vector<16x16xf32>
    %150 = arith.addf %146, %149 : vector<16x16xf32>
    %cst_54 = arith.constant dense<0.000000e+00> : vector<16x64xf32>
    %151 = tpu.matmul %150, %0, %cst_54 {dimension_numbers = #tpu.dot_dimension_numbers<[1], [0], [0], [1], [0, 0, 1, 1], [], []>} : vector<16x16xf32>, vector<16x64xf32>, vector<16x64xf32> -> vector<16x64xf32>
    %c0_55 = arith.constant 0 : index
    %c5_56 = arith.constant 5 : index
    %c0_57 = arith.constant 0 : index
    %c0_58 = arith.constant 0 : index
    %152 = vector.load %arg7[%c0_55, %c5_56, %c0_57, %c0_58] : memref<1x8x16x64xf32, #tpu.memory_space<vmem>>, vector<1x1x16x64xf32>
    %153 = vector.shape_cast %152 : vector<1x1x16x64xf32> to vector<16x64xf32>
    %154 = vector.shape_cast %151 : vector<16x64xf32> to vector<1x1x16x64xf32>
    tpu.vector_store %arg7[%c0_55, %c5_56, %c0_57, %c0_58], %154 {strides = array<i32>} : memref<1x8x16x64xf32, #tpu.memory_space<vmem>>, vector<1x1x16x64xf32>,
    %c6 = arith.constant 6 : index
    %155 = memref.load %arg4[%c6] : memref<32xf32, #tpu.memory_space<smem>>
    %156 = vector.broadcast %155 : f32 to vector<16x16xf32>
    %157 = arith.mulf %10, %156 : vector<16x16xf32>
    %c14 = arith.constant 14 : index
    %158 = memref.load %arg4[%c14] : memref<32xf32, #tpu.memory_space<smem>>
    %159 = vector.broadcast %158 : f32 to vector<16x16xf32>
    %160 = arith.mulf %20, %159 : vector<16x16xf32>
    %161 = arith.addf %157, %160 : vector<16x16xf32>
    %c22 = arith.constant 22 : index
    %162 = memref.load %arg4[%c22] : memref<32xf32, #tpu.memory_space<smem>>
    %163 = vector.broadcast %162 : f32 to vector<16x16xf32>
    %164 = arith.mulf %30, %163 : vector<16x16xf32>
    %165 = arith.addf %161, %164 : vector<16x16xf32>
    %c30 = arith.constant 30 : index
    %166 = memref.load %arg4[%c30] : memref<32xf32, #tpu.memory_space<smem>>
    %167 = vector.broadcast %166 : f32 to vector<16x16xf32>
    %168 = arith.mulf %40, %167 : vector<16x16xf32>
    %169 = arith.addf %165, %168 : vector<16x16xf32>
    %cst_59 = arith.constant dense<0.000000e+00> : vector<16x64xf32>
    %170 = tpu.matmul %169, %0, %cst_59 {dimension_numbers = #tpu.dot_dimension_numbers<[1], [0], [0], [1], [0, 0, 1, 1], [], []>} : vector<16x16xf32>, vector<16x64xf32>, vector<16x64xf32> -> vector<16x64xf32>
    %c0_60 = arith.constant 0 : index
    %c6_61 = arith.constant 6 : index
    %c0_62 = arith.constant 0 : index
    %c0_63 = arith.constant 0 : index
    %171 = vector.load %arg7[%c0_60, %c6_61, %c0_62, %c0_63] : memref<1x8x16x64xf32, #tpu.memory_space<vmem>>, vector<1x1x16x64xf32>
    %172 = vector.shape_cast %171 : vector<1x1x16x64xf32> to vector<16x64xf32>
    %173 = vector.shape_cast %170 : vector<16x64xf32> to vector<1x1x16x64xf32>
    tpu.vector_store %arg7[%c0_60, %c6_61, %c0_62, %c0_63], %173 {strides = array<i32>} : memref<1x8x16x64xf32, #tpu.memory_space<vmem>>, vector<1x1x16x64xf32>,
    %c7 = arith.constant 7 : index
    %174 = memref.load %arg4[%c7] : memref<32xf32, #tpu.memory_space<smem>>
    %175 = vector.broadcast %174 : f32 to vector<16x16xf32>
    %176 = arith.mulf %10, %175 : vector<16x16xf32>
    %c15 = arith.constant 15 : index
    %177 = memref.load %arg4[%c15] : memref<32xf32, #tpu.memory_space<smem>>
    %178 = vector.broadcast %177 : f32 to vector<16x16xf32>
    %179 = arith.mulf %20, %178 : vector<16x16xf32>
    %180 = arith.addf %176, %179 : vector<16x16xf32>
    %c23 = arith.constant 23 : index
    %181 = memref.load %arg4[%c23] : memref<32xf32, #tpu.memory_space<smem>>
    %182 = vector.broadcast %181 : f32 to vector<16x16xf32>
    %183 = arith.mulf %30, %182 : vector<16x16xf32>
    %184 = arith.addf %180, %183 : vector<16x16xf32>
    %c31 = arith.constant 31 : index
    %185 = memref.load %arg4[%c31] : memref<32xf32, #tpu.memory_space<smem>>
    %186 = vector.broadcast %185 : f32 to vector<16x16xf32>
    %187 = arith.mulf %40, %186 : vector<16x16xf32>
    %188 = arith.addf %184, %187 : vector<16x16xf32>
    %cst_64 = arith.constant dense<0.000000e+00> : vector<16x64xf32>
    %189 = tpu.matmul %188, %0, %cst_64 {dimension_numbers = #tpu.dot_dimension_numbers<[1], [0], [0], [1], [0, 0, 1, 1], [], []>} : vector<16x16xf32>, vector<16x64xf32>, vector<16x64xf32> -> vector<16x64xf32>
    %c0_65 = arith.constant 0 : index
    %c7_66 = arith.constant 7 : index
    %c0_67 = arith.constant 0 : index
    %c0_68 = arith.constant 0 : index
    %190 = vector.load %arg7[%c0_65, %c7_66, %c0_67, %c0_68] : memref<1x8x16x64xf32, #tpu.memory_space<vmem>>, vector<1x1x16x64xf32>
    %191 = vector.shape_cast %190 : vector<1x1x16x64xf32> to vector<16x64xf32>
    %192 = vector.shape_cast %189 : vector<16x64xf32> to vector<1x1x16x64xf32>
    tpu.vector_store %arg7[%c0_65, %c7_66, %c0_67, %c0_68], %192 {strides = array<i32>} : memref<1x8x16x64xf32, #tpu.memory_space<vmem>>, vector<1x1x16x64xf32>,
    return
  }
  func.func @transform_0(%arg0: i32, %arg1: i32, %arg2: memref<4xf32, #tpu.memory_space<smem>>, %arg3: memref<4xf32, #tpu.memory_space<smem>>, %arg4: memref<32xf32, #tpu.memory_space<smem>>) -> (i32, i32, i32, i32) {
    %c0_i32 = arith.constant 0 : i32
    %c0_i32_0 = arith.constant 0 : i32
    %c0_i32_1 = arith.constant 0 : i32
    return %arg0, %c0_i32, %arg1, %c0_i32_0 : i32, i32, i32, i32
  }
  func.func @transform_1(%arg0: i32, %arg1: i32, %arg2: memref<4xf32, #tpu.memory_space<smem>>, %arg3: memref<4xf32, #tpu.memory_space<smem>>, %arg4: memref<32xf32, #tpu.memory_space<smem>>) -> (i32, i32) {
    %c0_i32 = arith.constant 0 : i32
    %c0_i32_0 = arith.constant 0 : i32
    %c0_i32_1 = arith.constant 0 : i32
    return %c0_i32, %c0_i32_0 : i32, i32
  }
  func.func @transform_2(%arg0: i32, %arg1: i32, %arg2: memref<4xf32, #tpu.memory_space<smem>>, %arg3: memref<4xf32, #tpu.memory_space<smem>>, %arg4: memref<32xf32, #tpu.memory_space<smem>>) -> (i32, i32, i32, i32) {
    %c0_i32 = arith.constant 0 : i32
    %c0_i32_0 = arith.constant 0 : i32
    %c0_i32_1 = arith.constant 0 : i32
    return %arg0, %c0_i32, %arg1, %c0_i32_0 : i32, i32, i32, i32
  }
}

</mosaic_0001>

<bundles_post_ra>
// kernel: tpu_custom_call.1
= control target key start
LH: loop header
LB: loop body
LE: loop exit
PB: predicated region body
PF: predicated region fallthrough
CT: control target
= control target key end

     0   :  { %s2258_s0 = inlined_call_operand.hbm [shape: f32[4], index: 0, kind: input, shape index: {}]   ;;  %s2259_s3 = inlined_call_operand.hbm [shape: f32[2,4,16,16], index: 3, kind: input, shape index: {}]   ;;  %s2260_s4 = inlined_call_operand.hbm [shape: f32[16,64], index: 4, kind: input, shape index: {}]   ;;  %s2261_s5 = inlined_call_operand.hbm [shape: f32[2,8,16,64], index: 5, kind: output, shape index: {}]   ;;  %s2262_s1 = inlined_call_operand.vmem [shape: f32[4], index: 1, kind: input, shape index: {}]   ;;  %s2263_s2 = inlined_call_operand.vmem [shape: f32[32], index: 2, kind: input, shape index: {}]  }
   0x1   :  { %s1519_s20 = scalar_lea.hbm %s2258_s0, 16 }
   0x2   :  { %p1520_p0 = scmp.ne.s32.totalorder %s2258_s0, %s1519_s20  ;;  %p1523_p1 = scmp.lt.u32.totalorder %s1519_s20, %s2258_s0 }
   0x4   :  { %p1525_p2 = pnand %p1523_p1, %p1520_p0 }
   0x6   :  { %1528 = shalt.err (!%p1525_p2)  }
   0x7   :  { %s1701_s25 = smov [#allocation3]   ;;  %s12_s30 = sshll.u32 %s2262_s1, 4  ;;  %s13_s30 = int_to_ptr.vmem [resolvable:$true] %s12_s30 }
   0x8   :  { %11 = dma.hbm_to_smem %s2258_s0, 16, %s1701_s25, [#allocation2] }
   0x9   :  { %s16_s8 = sshll.u32 %s2263_s2, 4  ;;  %s1529_s9 = scalar_lea.vmem %s13_s30, 16  ;;  %s17_s8 = int_to_ptr.vmem [resolvable:$true] %s16_s8 }
   0xa   :  { %p1530_p3 = scmp.ne.s32.totalorder %s13_s30, %s1529_s9  ;;  %p1534_p4 = scmp.lt.s32.totalorder %s13_s30, %s13_s30 }
   0xb   :  { %p1535_p5 = scmp.lt.s32.totalorder %s1529_s9, %s1529_s9 }
   0xd   :  { %p1536_p6 = por %p1535_p5, %p1534_p4 }
   0xf   :  { %p1537_p7 = pnand %p1536_p6, %p1530_p3 }
  0x11   :  { %1540 = shalt.err (!%p1537_p7)  }
  0x12   :  { %s1702_s10 = smov [#allocation4]   ;;  %s1541_s0 = scalar_lea.vmem %s17_s8, 16 }
  0x13   :  { %15 = dma.vmem_to_smem %s13_s30, 16, %s1702_s10, [#allocation2] }
  0x14   :  { %p1542_p8 = scmp.ne.s32.totalorder %s17_s8, %s1541_s0  ;;  %p1546_p9 = scmp.lt.s32.totalorder %s17_s8, %s17_s8 }
  0x15   :  { %p1547_p10 = scmp.lt.s32.totalorder %s1541_s0, %s1541_s0 }
  0x17   :  { %p1548_p11 = por %p1547_p10, %p1546_p9 }
  0x19   :  { %p1549_p12 = pnand %p1548_p11, %p1542_p8 }
  0x1b   :  { %1552 = shalt.err (!%p1549_p12)  }
  0x1c   :  { %s1703_s1 = smov [#allocation5]  }
  0x1d   :  { %19 = dma.vmem_to_smem %s17_s8, 16, %s1703_s1, [#allocation2] }
  0x1e   :  { %1663 = dma.done.wait [#allocation2], 48 }
  0x1f   :  { %1664 = vsyncadd [#allocation2], 4294967248 }
  0x20   :  { %21 = sfence }
  0x21   :  { %22 = vsyncpa [#allocation7], 0 }
  0x22   :  { %24 = vsyncpa [#allocation7 + $0x1], 0 }
  0x23   :  { %25 = vsyncpa [#allocation10], 0 }
  0x24   :  { %26 = vsyncpa [#allocation8], 0 }
  0x25   :  { %28 = vsyncpa [#allocation8 + $0x1], 0  ;;  %s1759_s2 = smov 0   ;;  %s1761_s11 = smov 0  }
  0x26   :  { %s1763_s12 = smov 0   ;;  %s1765_s13 = smov 0  }
  0x27   :  { %s1767_s14 = smov 0   ;;  %s1769_s15 = smov 0  }
  0x28 LB: > { %s1227_s16 = sadd.s32 4294967295, %s1699_s15   ;;  %s1228_s17 = sadd.s32 4294967294, %s1699_s15   ;;  %s1699_s15 = sphi %s1769_s15, %s34_s15   ;;  %s1695_s14 = sphi %s1767_s14, %s2287_s14   ;;  %s1691_s13 = sphi %s1765_s13, %s2286_s13   ;;  %s1687_s12 = sphi %s1763_s12, %s2285_s12   ;;  %s1683_s11 = sphi %s1761_s11, %s2284_s11   ;;  %s1679_s2 = sphi %s1759_s2, %s2283_s2  }
  0x29   : > { %p68_p13 = scmp.ne.s32.totalorder %s1683_s11, %s1679_s2  ;;  %p1793_p0 = scmp.eq.s32.totalorder %s1227_s16, 0 }
  0x2a   : > { %p1797_p1 = scmp.eq.s32.totalorder %s1227_s16, 1  ;;  %p121_p2 = scmp.eq.s32.totalorder %s1228_s17, 1 }
  0x2b   : > { %s2268_s18 = scalar_select %p1793_p0, 1, 0 }
  0x2c   : > { %s2269_s19 = scalar_select %p1797_p1, 1, 0 }
  0x2d   : > { %p1803_p3 = por %p1793_p0, %p68_p13  ;;  %p1229_p4 = scmp.ge.s32.totalorder %s1699_s15, 1 }
  0x2e   : > { %p1808_p5 = por %p121_p2, %p68_p13  ;;  %p128_p6 = scmp.lt.s32.totalorder %s1699_s15, 3 }
  0x2f   : > { %s2270_s20 = scalar_select %p1803_p3, 1, 0 }
  0x30   : > { %s2271_s21 = scalar_select %p1808_p5, 1, 0 }
  0x31   : > { %p1813_p7 = pnand %p1229_p4, %p128_p6  ;;  %s1704_s23 = smov [#allocation9]  }
  0x32   : > { %s140_s24 = sshll.u32 %s1704_s23, 4  ;;  %s46_s26 = sadd.s32 1, %s1695_s14  ;;  %s141_s24 = int_to_ptr.vmem [resolvable:$true] %s140_s24 }
  0x33   : > { %s2272_s22 = scalar_select %p1813_p7, 1, 0 }
  0x34   : > { %p1447_p8 = pneg %p1813_p7  ;;  %s1553_s29 = scalar_lea.hbm %s2260_s4, 256 }
  0x35   : > { %p1554_p11 = scmp.ne.s32.totalorder %s2260_s4, %s1553_s29  ;;  %p1560_p4 = scmp.lt.u32.totalorder %s1553_s29, %s2260_s4 }
  0x36   : > { %p1822_p10 = pnand %p1447_p8, %p1793_p0 }
  0x38   : > { %p1555_p12 = pneg %p1822_p10 }
  0x3a   : > { %p1556_p13 = pnand %p1555_p12, %p1554_p11 }
  0x3c   : > { %p1557_p2 = pneg %p1556_p13 }
  0x3e   : > { %p1562_p6 = pnand %p1560_p4, %p1557_p2 }
  0x40   : > { %1565 = shalt.err (!%p1562_p6)
}
  0x41   : > { %s1566_s9 = scalar_lea.vmem %s141_s24, 256  ;;  %p1574_p0 = scmp.lt.s32.totalorder %s141_s24, %s141_s24 }
  0x42   : > { %p1567_p8 = scmp.ne.s32.totalorder %s141_s24, %s1566_s9  ;;  %p1575_p3 = scmp.lt.s32.totalorder %s1566_s9, %s1566_s9 }
  0x44   : > { %p1569_p9 = pnand %p1567_p8, %p1555_p12  ;;  %p1576_p7 = por %p1575_p3, %p1574_p0 }
  0x46   : > { %p1570_p5 = pneg %p1569_p9 }
  0x48   : > { %p1577_p1 = pnand %p1576_p7, %p1570_p5 }
  0x4a   : > { %1580 = shalt.err (!%p1577_p1)
}
  0x4b   : > { %s1705_s10 = smov 128   ;;  %s1706_s0 = smov 8  }
  0x4c   : > { %1450 = dma.hbm_to_vmem [thread:$0]  (!%p1822_p10), %s2260_s4, 256, %s141_s24, [#allocation10], %s1705_s10, %s1705_s10, %s1706_s0  }
  0x4d   : > { %p48_p0 = scmp.ge.s32.totalorder %s46_s26, 2  ;;  %s55_s17 = sadd.s32 1, %s1687_s12 }
  0x4e   : > { %p62_p1 = scmp.ne.s32.totalorder %s1687_s12, %s1683_s11  ;;  %p63_p3 = scmp.eq.s32.totalorder %s1699_s15, 0 }
  0x4f   : > { %s2289_s26 = smov (%p48_p0, %s46_s26), 0  ;;  %p2275_p7 = scmp.ne.s32.totalorder %s2269_s19, 0 }
  0x50   : > { %p1852_p5 = por %p63_p3, %p62_p1  ;;  %s50_s27 = ssub.s32 %s1695_s14, %s2289_s26 }
  0x51   : > { %p1858_p9 = por %p2275_p7, %p62_p1  ;;  %p1460_p11 = scmp.lt.s32.totalorder %s1699_s15, 2 }
  0x52   : > { %p53_p10 = scmp.eq.s32.totalorder %s50_s27, 0  ;;  %s154_s24 = sand.u32 1, %s1687_s12  }
  0x53   : > { %s1232_s28 = sshll.u32 %s154_s24, 6  ;;  %s1317_s30 = sshll.u32 %s1695_s14, 10 }
  0x54   : > { %s1867_s29 = scalar_select %p53_p10, %s1687_s12, %s55_s17  }
  0x55   : > { %s1873_s8 = scalar_lea.hbm %s2259_s3, %s1317_s30  ;;  %s158_s19 = scalar_lea.vmem [#allocation6], %s1232_s28 }
  0x56   : > { %s167_s9 = sshll.u32 %s158_s19, 4  ;;  %p1879_p12 = pnand %p1460_p11, %p1852_p5  ;;  %s1875_s9 = int_to_ptr.vmem [resolvable:$true] %s167_s9 }
  0x57   : > { %s1883_s16 = scalar_lea.sflag [#allocation7], %s154_s24  ;;  %s1581_s17 = scalar_lea.hbm %s1873_s8, 1024 }
  0x58   : > { %p1582_p13 = scmp.ne.s32.totalorder %s1873_s8, %s1581_s17  ;;  %p1583_p2 = pneg %p1879_p12 }
  0x59   : > { %s1586_s23 = scalar_lea.hbm %s2259_s3, 2048  ;;  %p1587_p8 = scmp.lt.u32.totalorder %s1873_s8, %s2259_s3 }
  0x5a   : > { %p1584_p4 = pnand %p1583_p2, %p1582_p13  ;;  %p1588_p0 = scmp.lt.u32.totalorder %s1586_s23, %s1581_s17 }
  0x5b   : > { %p1590_p3 = scmp.lt.u32.totalorder %s1581_s17, %s1873_s8 }
  0x5c   : > { %p1585_p6 = pneg %p1584_p4  ;;  %p1589_p1 = por %p1588_p0, %p1587_p8 }
  0x5e   : > { %p1591_p5 = por %p1590_p3, %p1589_p1 }
  0x60   : > { %p1592_p7 = pnand %p1591_p5, %p1585_p6 }
  0x62   : > { %1595 = shalt.err (!%p1592_p7)
}
  0x63   : > { %s1596_s24 = scalar_lea.vmem %s1875_s9, 1024  ;;  %s1707_s7 = smov [#allocation6]  }
  0x64   : > { %p1597_p11 = scmp.ne.s32.totalorder %s1875_s9, %s1596_s24  ;;  %s1601_s19 = sshll.u32 %s1707_s7, 4  ;;  %s1602_s19 = int_to_ptr.vmem [resolvable:$false] %s1601_s19 }
  0x65   : > { %s1603_s27 = scalar_lea.vmem %s1602_s19, 2048  ;;  %p1604_p4 = scmp.lt.s32.totalorder %s1875_s9, %s1602_s19 }
  0x66   : > { %p1599_p10 = pnand %p1597_p11, %p1583_p2  ;;  %p1605_p8 = scmp.lt.s32.totalorder %s1603_s27, %s1596_s24 }
  0x68   : > { %p1600_p13 = pneg %p1599_p10  ;;  %p1606_p0 = por %p1605_p8, %p1604_p4 }
  0x6a   : > { %p1607_p1 = pnand %p1606_p0, %p1600_p13 }
  0x6c   : > { %1610 = shalt.err (!%p1607_p1)
}
  0x6d   : > { %1454 = dma.hbm_to_vmem [thread:$0]  (!%p1879_p12), %s1873_s8, 1024, %s1875_s9, %s1883_s16, %s1705_s10, %s1705_s10, %s1706_s0  }
  0x6e   : > { %p2278_p2 = scmp.ne.s32.totalorder %s2272_s22, 0 }
  0x6f   : > { %s1917_s17 = sand.u32 (!%p2278_p2), 1, %s1683_s11   ;;  %p2279_p6 = scmp.ne.s32.totalorder (!%p2278_p2), %s2270_s20, 0 }
  0x70   : > { %179 = sbr.rel (%p2278_p2) target bundleno = 406 (0x196), region = 28  ;;  %s1236_s28 = sshll.u32 (!%p2278_p2), %s1917_s17, 6 }
  0x71   : > { %s182_s23 = scalar_lea.sflag (!%p2278_p2), [#allocation7], %s1917_s17  ;;  %s1921_s30 = scalar_lea.vmem (!%p2278_p2), [#allocation6], %s1236_s28 }
  0x77   : > { %1666 = dma.done.wait (%p2279_p6), %s182_s23, 1024  }
  0x78   : > { %1668 = vsyncadd (%p2279_p6), %s182_s23, 4294966272  ;;  %p2280_p12 = scmp.ne.s32.totalorder %s2268_s18, 0 }
  0x7a   : > { %1670 = dma.done.wait (%p2280_p12), [#allocation10], 256  }
  0x7b   : > { %1672 = vsyncadd (%p2280_p12), [#allocation10], 4294967040  ;;  %s216_s22 = sld [smem:[#allocation3]]  ;;  %s1241_s0 = sld [smem:[#allocation3 + $0x1]]  ;;  %v212_v0 = vld [vmem:[#allocation9] sm:$0xff]  ;;  %v213_v1 = vld [vmem:[#allocation9 + $0x8] sm:$0xff] }
  0x7c   : > { %s1931_s10 = sld [smem:[#allocation4]]  ;;  %s1933_s8 = sld [smem:[#allocation4 + $0x1]]  ;;  %v214_v2 = vld [vmem:[%s1921_s30] sm:$0xff]  ;;  %v1949_v5 = vpack.c.bf16 %v213_v1, %v212_v0  ;;  %v215_v6 = vld [vmem:[%s1921_s30 + $0x8] sm:$0xff]  ;;  %v1239_v8 = vld [vmem:[%s1921_s30 + $0x10] sm:$0xff]  ;;  %vm287_vm0 = vcmask 130048  }
  0x7d   : > { %s1935_s9 = sld [smem:[#allocation3 + $0x2]]  ;;  %s1939_s1 = sld [smem:[#allocation3 + $0x3]]  ;;  %v1240_v9 = vld [vmem:[%s1921_s30 + $0x18] sm:$0xff]  ;;  %v1243_v15 = vld [vmem:[%s1921_s30 + $0x20] sm:$0xff]  ;;  %v1244_v16 = vld [vmem:[%s1921_s30 + $0x28] sm:$0xff]  ;;  %vm369_vm1 = vcmask 523264  }
  0x7e   : > { %s1937_s20 = sld [smem:[#allocation4 + $0x2]]  ;;  %s1941_s16 = sld [smem:[#allocation4 + $0x3]]  ;;  %v1247_v17 = vld [vmem:[%s1921_s30 + $0x30] sm:$0xff]  ;;  %1408 = vmatprep.subr.bf16.mxu0 %v1949_v5  ;;  %1412 = vmatprep.subr.bf16.mxu1 %v1949_v5  ;;  %v1248_v21 = vld [vmem:[%s1921_s30 + $0x38] sm:$0xff] }
  0x7f   : > { %s1943_s18 = sld [smem:[#allocation5]]  ;;  %s1968_s19 = sld [smem:[#allocation5 + $0x1]]  ;;  %1410 = vmatpush3.bf16.msra.mxu0 %v1949_v5  ;;  %1414 = vmatpush3.bf16.msra.mxu1 %v1949_v5 }
  0x80   : > { %s1947_s6 = sld [smem:[#allocation5 + $0x8]]  ;;  %s1973_s27 = sld [smem:[#allocation5 + $0x9]]  ;;  %1416 = vmatprep.subr.bf16.mxu0 %v1949_v5  ;;  %1420 = vmatprep.subr.bf16.mxu1 %v1949_v5 }
  0x81   : > { %v217_v3 = vstv %s216_s22  ;;  %v230_v10 = vstv %s1241_s0  ;;  %s1954_s24 = sld [smem:[#allocation5 + $0x10]]  ;;  %s1975_s28 = sld [smem:[#allocation5 + $0x11]] }
  0x82   : > { %v221_v4 = vstv %s1931_s10  ;;  %v218_v7 = vmul.f32 %v217_v3, %v214_v2  ;;  %v219_v11 = vmul.f32 %v217_v3, %v215_v6  ;;  %v231_v12 = vmul.f32 %v1239_v8, %v230_v10  ;;  %s1960_s7 = sld [smem:[#allocation5 + $0x18]]  ;;  %s1987_s23 = sld [smem:[#allocation5 + $0x19]] }
  0x83   : > { %v232_v13 = vmul.f32 %v1240_v9, %v230_v10  ;;  %v234_v14 = vstv %s1933_s8  ;;  %v243_v19 = vstv %s1935_s9  ;;  %v256_v22 = vstv %s1939_s1  ;;  %s1993_s30 = sld [smem:[#allocation5 + $0x2]]  ;;  %s2020_s8 = sld [smem:[#allocation5 + $0x3]] }
  0x84   : > { %v222_v18 = vadd.f32 %v221_v4, %v218_v7  ;;  %v247_v20 = vstv %s1937_s20  ;;  %v223_v23 = vadd.f32 %v221_v4, %v219_v11  ;;  %v235_v24 = vadd.f32 %v234_v14, %v231_v12  ;;  %s1995_s22 = sld [smem:[#allocation5 + $0xa]]  ;;  %s2025_s9 = sld [smem:[#allocation5 + $0xb]] }
  0x85   : > { %v236_v25 = vadd.f32 %v234_v14, %v232_v13  ;;  %v260_v26 = vstv %s1941_s16  ;;  %v244_v28 = vmul.f32 %v1243_v15, %v243_v19  ;;  %v245_v29 = vmul.f32 %v1244_v16, %v243_v19  ;;  %s2009_s10 = sld [smem:[#allocation5 + $0x12]]  ;;  %s2031_s20 = sld [smem:[#allocation5 + $0x13]] }
  0x86   : > { %v1977_v27 = vmax.f32 %v222_v18, 0.0  ;;  %v257_v30 = vmul.f32 %v1247_v17, %v256_v22  ;;  %v1981_v31 = vmax.f32 %v223_v23, 0.0  ;;  %v1983_v32 = vmax.f32 %v235_v24, 0.0  ;;  %s2018_s0 = sld [smem:[#allocation5 + $0x1a]]  ;;  %s2033_s1 = sld [smem:[#allocation5 + $0x1b]] }
  0x87   : > { %v1985_v33 = vmax.f32 %v236_v25, 0.0  ;;  %v258_v34 = vmul.f32 %v1248_v21, %v256_v22  ;;  %v248_v35 = vadd.f32 %v247_v20, %v244_v28  ;;  %v249_v36 = vadd.f32 %v247_v20, %v245_v29  ;;  %s2037_s16 = sld [smem:[#allocation5 + $0x4]] }
  0x88   : > { %v261_v37 = vadd.f32 %v260_v26, %v257_v30  ;;  %v266_v38 = vstv %s1943_s18  ;;  %v270_v42 = vstv %s1947_s6  ;;  %v276_v49 = vstv %s1954_s24  ;;  %s2045_s18 = sld [smem:[#allocation5 + $0xc]] }
  0x89   : > { %v262_v39 = vadd.f32 %v260_v26, %v258_v34  ;;  %v267_v40 = vmul.f32 %v266_v38, %v1977_v27  ;;  %v268_v41 = vmul.f32 %v266_v38, %v1981_v31  ;;  %v1997_v43 = vmax.f32 %v248_v35, 0.0  ;;  %s2051_s6 = sld [smem:[#allocation5 + $0x14]] }
  0x8a   : > { %v1999_v44 = vmax.f32 %v249_v36, 0.0  ;;  %v2001_v45 = vmax.f32 %v261_v37, 0.0  ;;  %v271_v46 = vmul.f32 %v270_v42, %v1983_v32  ;;  %v272_v48 = vmul.f32 %v270_v42, %v1985_v33  ;;  %s2055_s24 = sld [smem:[#allocation5 + $0x1c]] }
  0x8b   : > { %v2004_v47 = vmax.f32 %v262_v39, 0.0  ;;  %v282_v50 = vstv %s1960_s7  ;;  %v277_v52 = vmul.f32 %v276_v49, %v1997_v43  ;;  %v373_v56 = vstv %s1968_s19  ;;  %s2067_s7 = sld [smem:[#allocation5 + $0x5]] }
  0x8c   : > { %v273_v51 = vadd.f32 %v271_v46, %v267_v40  ;;  %v278_v53 = vmul.f32 %v276_v49, %v1999_v44  ;;  %v283_v54 = vmul.f32 %v282_v50, %v2001_v45  ;;  %v377_v57 = vstv %s1973_s27  ;;  %s2069_s19 = sld [smem:[#allocation5 + $0xd]] }
  0x8d   : > { %v284_v55 = vmul.f32 %v282_v50, %v2004_v47  ;;  %v383_v58 = vstv %s1975_s28  ;;  %v374_v60 = vmul.f32 %v373_v56, %v1977_v27  ;;  %v375_v61 = vmul.f32 %v373_v56, %v1981_v31  ;;  %s2076_s27 = sld [smem:[#allocation5 + $0x15]] }
  0x8e   : > { %v279_v59 = vadd.f32 %v277_v52, %v273_v51  ;;  %v378_v62 = vmul.f32 %v377_v57, %v1983_v32  ;;  %v379_v63 = vmul.f32 %v377_v57, %v1985_v33  ;;  %v384_v0 = vmul.f32 %v383_v58, %v1997_v43  ;;  %s2083_s28 = sld [smem:[#allocation5 + $0x1d]] }
  0x8f   : > { %v385_v1 = vmul.f32 %v383_v58, %v1999_v44  ;;  %v389_v2 = vstv %s1987_s23  ;;  %v274_v8 = vadd.f32 %v272_v48, %v268_v41  ;;  %v479_v10 = vstv %s1993_s30  ;;  %s2092_s23 = sld [smem:[#allocation5 + $0x6]] }
  0x90   : > { %v285_v3 = vadd.f32 %v283_v54, %v279_v59  ;;  %v380_v4 = vadd.f32 %v378_v62, %v374_v60  ;;  %v390_v6 = vmul.f32 %v389_v2, %v2001_v45  ;;  %v391_v7 = vmul.f32 %v389_v2, %v2004_v47  ;;  %s2094_s30 = sld [smem:[#allocation5 + $0xe]] }
  0x91   : > { %v381_v9 = vadd.f32 %v379_v63, %v375_v61  ;;  %v483_v11 = vstv %s1995_s22  ;;  %v480_v13 = vmul.f32 %v479_v10, %v1977_v27  ;;  %v481_v14 = vmul.f32 %v479_v10, %v1981_v31  ;;  %s2100_s22 = sld [smem:[#allocation5 + $0x16]] }
  0x92   : > { %1355 = vmatprep.mubr.msk.f32.mxu0 %vm287_vm0, %v285_v3  ;;  %v386_v12 = vadd.f32 %v384_v0, %v380_v4  ;;  %v484_v15 = vmul.f32 %v483_v11, %v1983_v32  ;;  %v280_v16 = vadd.f32 %v278_v53, %v274_v8  ;;  %v485_v18 = vmul.f32 %v483_v11, %v1985_v33 }
  0x93   : > { %v387_v17 = vadd.f32 %v385_v1, %v381_v9  ;;  %v489_v19 = vstv %s2009_s10  ;;  %v495_v26 = vstv %s2018_s0  ;;  %v585_v28 = vstv %s2020_s8  ;;  %s2106_s10 = sld [smem:[#allocation5 + $0x1e]]  ;;  %s2108_s0 = sld [smem:[#allocation5 + $0x7]] }
  0x94   : > { %v392_v20 = vadd.f32 %v390_v6, %v386_v12  ;;  %v486_v21 = vadd.f32 %v484_v15, %v480_v13  ;;  %v490_v22 = vmul.f32 %v489_v19, %v1997_v43  ;;  %v491_v23 = vmul.f32 %v489_v19, %v1999_v44  ;;  %s2116_s8 = sld [smem:[#allocation5 + $0xf]] }
  0x95   : > { %v286_v24 = vadd.f32 %v284_v55, %v280_v16  ;;  %v393_v25 = vadd.f32 %v391_v7, %v387_v17  ;;  %v496_v30 = vmul.f32 %v495_v26, %v2001_v45  ;;  %v497_v34 = vmul.f32 %v495_v26, %v2004_v47 }
  0x96   : > { %1362 = vmatprep.mubr.msk.f32.mxu1 %vm287_vm0, %v392_v20  ;;  %v492_v29 = vadd.f32 %v490_v22, %v486_v21  ;;  %v586_v35 = vmul.f32 %v585_v28, %v1977_v27  ;;  %v587_v36 = vmul.f32 %v585_v28, %v1981_v31  ;;  %v589_v37 = vstv %s2025_s9  ;;  %s2123_s9 = sld [smem:[#allocation5 + $0x17]] }
  0x97   : > { %1356 = vmatmul.mubr.msk.f32.vlgmr.msra.gmra.mrb[0].mxu0 %vm287_vm0, %v286_v24  ;;  %1363 = vmatmul.mubr.msk.f32.vlgmr.msra.gmra.mrb[0].mxu1 %vm287_vm0, %v393_v25  ;;  %v595_v38 = vstv %s2031_s20  ;;  %v601_v39 = vstv %s2033_s1  ;;  %v590_v41 = vmul.f32 %v589_v37, %v1983_v32  ;;  %v591_v42 = vmul.f32 %v589_v37, %v1985_v33  ;;  %s2125_s20 = sld [smem:[#allocation5 + $0x1f]]  ;;  %s1238_s1 = sshll.u32 %s1917_s17, 7 }
  0x98   : > { %1418 = vmatpush3.bf16.msra.mxu0 %v1949_v5  ;;  %1422 = vmatpush3.bf16.msra.mxu1 %v1949_v5  ;;  %v498_v40 = vadd.f32 %v496_v30, %v492_v29  ;;  %v691_v46 = vstv %s2037_s16  ;;  %v596_v48 = vmul.f32 %v595_v38, %v1997_v43  ;;  %v597_v49 = vmul.f32 %v595_v38, %v1999_v44  ;;  %s2168_s16 = scalar_lea.vmem [#allocation11], %s1238_s1 }
  0x99   : > { %v602_v50 = vmul.f32 %v601_v39, %v2001_v45  ;;  %v603_v51 = vmul.f32 %v601_v39, %v2004_v47  ;;  %1424 = vmatprep.subr.bf16.mxu0 %v1949_v5  ;;  %v592_v52 = vadd.f32 %v590_v41, %v586_v35  ;;  %1428 = vmatprep.subr.bf16.mxu1 %v1949_v5  ;;  %v695_v55 = vstv %s2045_s18  ;;  %s1318_s18 = sshll.u32 %s1691_s13, 11  ;;  %s1115_s13 = scalar_lea.sflag [#allocation8], %s1917_s17 }
  0x9a   : > { %1369 = vmatprep.mubr.msk.f32.mxu0 %vm287_vm0, %v498_v40  ;;  %v487_v53 = vadd.f32 %v485_v18, %v481_v14  ;;  %v593_v54 = vadd.f32 %v591_v42, %v587_v36  ;;  %v692_v56 = vmul.f32 %v691_v46, %v1977_v27  ;;  %v693_v57 = vmul.f32 %v691_v46, %v1981_v31 }
  0x9b   : > { %v696_v58 = vmul.f32 %v695_v55, %v1983_v32  ;;  %v697_v59 = vmul.f32 %v695_v55, %v1985_v33  ;;  %v598_v60 = vadd.f32 %v596_v48, %v592_v52  ;;  %v701_v63 = vstv %s2051_s6  ;;  %s1130_s6 = sshll.u32 %s2168_s16, 4  ;;  %s2201_s6 = int_to_ptr.vmem [resolvable:$true] %s1130_s6 }
  0x9c   : > { %v493_v61 = vadd.f32 %v491_v23, %v487_v53  ;;  %v599_v62 = vadd.f32 %v597_v49, %v593_v54  ;;  %v702_v1 = vmul.f32 %v701_v63, %v1997_v43  ;;  %v703_v2 = vmul.f32 %v701_v63, %v1999_v44 }
  0x9d   : > { %v698_v0 = vadd.f32 %v696_v58, %v692_v56  ;;  %v707_v3 = vstv %s2055_s24  ;;  %v604_v4 = vadd.f32 %v602_v50, %v598_v60  ;;  %v797_v11 = vstv %s2067_s7 }
  0x9e   : > { %v499_v6 = vadd.f32 %v497_v34, %v493_v61  ;;  %v605_v7 = vadd.f32 %v603_v51, %v599_v62  ;;  %v708_v8 = vmul.f32 %v707_v3, %v2001_v45  ;;  %v709_v10 = vmul.f32 %v707_v3, %v2004_v47 }
  0x9f   : > { %v704_v9 = vadd.f32 %v702_v1, %v698_v0  ;;  %v801_v12 = vstv %s2069_s19  ;;  %1376 = vmatprep.mubr.msk.f32.mxu1 %vm287_vm0, %v604_v4  ;;  %v798_v13 = vmul.f32 %v797_v11, %v1977_v27  ;;  %v799_v14 = vmul.f32 %v797_v11, %v1981_v31  ;;  %s2199_s19 = scalar_lea.hbm %s2261_s5, %s1318_s18 }
  0xa0   : > { %1370 = vmatmul.mubr.msk.f32.vlgmr.msra.gmra.mrb[2].mxu0 %vm287_vm0, %v499_v6  ;;  %v802_v15 = vmul.f32 %v801_v12, %v1983_v32  ;;  %v807_v16 = vstv %s2076_s27  ;;  %1377 = vmatmul.mubr.msk.f32.vlgmr.msra.gmra.mrb[2].mxu1 %vm287_vm0, %v605_v7  ;;  %v803_v18 = vmul.f32 %v801_v12, %v1985_v33  ;;  %v813_v20 = vstv %s2083_s28  ;;  %s1611_s27 = scalar_lea.vmem %s2201_s6, 2048  ;;  %s1708_s28 = smov [#allocation11]  }
  0xa1   : > { %1426 = vmatpush3.bf16.msra.mxu0 %v1949_v5  ;;  %v710_v17 = vadd.f32 %v708_v8, %v704_v9  ;;  %v808_v19 = vmul.f32 %v807_v16, %v1997_v43  ;;  %1430 = vmatpush3.bf16.msra.mxu1 %v1949_v5  ;;  %v809_v22 = vmul.f32 %v807_v16, %v1999_v44  ;;  %v903_v28 = vstv %s2092_s23  ;;  %p1612_p3 = scmp.ne.s32.totalorder %s2201_s6, %s1611_s27  ;;  %s1615_s23 = sshll.u32 %s1708_s28, 4  ;;  %s1616_s23 = int_to_ptr.vmem [resolvable:$false] %s1615_s23 }
  0xa2   : > { %v804_v21 = vadd.f32 %v802_v15, %v798_v13  ;;  %v814_v23 = vmul.f32 %v813_v20, %v2001_v45  ;;  %v815_v24 = vmul.f32 %v813_v20, %v2004_v47  ;;  %1432 = vmatprep.subr.bf16.mxu0 %v1949_v5  ;;  %v699_v25 = vadd.f32 %v697_v59, %v693_v57  ;;  %p1618_p11 = scmp.lt.s32.totalorder %s2201_s6, %s1616_s23 }
  0xa3   : > { %1383 = vmatprep.mubr.msk.f32.mxu0 %vm287_vm0, %v710_v17  ;;  %v805_v26 = vadd.f32 %v803_v18, %v799_v14  ;;  %v907_v29 = vstv %s2094_s30  ;;  %1436 = vmatprep.subr.bf16.mxu1 %v1949_v5  ;;  %v904_v34 = vmul.f32 %v903_v28, %v1977_v27  ;;  %v905_v38 = vmul.f32 %v903_v28, %v1981_v31  ;;  %p1613_p5 = pnand %p1612_p3, %p1858_p9  ;;  %s1617_s30 = scalar_lea.vmem %s1616_s23, 4096 }
  0xa4   : > { %v810_v30 = vadd.f32 %v808_v19, %v804_v21  ;;  %v908_v35 = vmul.f32 %v907_v29, %v1983_v32  ;;  %v705_v36 = vadd.f32 %v703_v2, %v699_v25  ;;  %v913_v39 = vstv %s2100_s22  ;;  %p1619_p10 = scmp.lt.s32.totalorder %s1617_s30, %s1611_s27 }
  0xa5   : > { %v811_v37 = vadd.f32 %v809_v22, %v805_v26  ;;  %v909_v41 = vmul.f32 %v907_v29, %v1985_v33  ;;  %v914_v46 = vmul.f32 %v913_v39, %v1997_v43  ;;  %v919_v50 = vstv %s2106_s10  ;;  %p1614_p7 = pneg %p1613_p5 }
  0xa6   : > { %v816_v40 = vadd.f32 %v814_v23, %v810_v30  ;;  %v910_v42 = vadd.f32 %v908_v35, %v904_v34  ;;  %v711_v48 = vadd.f32 %v709_v10, %v705_v36  ;;  %v1009_v51 = vstv %s2108_s0  ;;  %p1620_p13 = por %p1619_p10, %p1618_p11 }
  0xa7   : > { %v817_v49 = vadd.f32 %v815_v24, %v811_v37  ;;  %v915_v52 = vmul.f32 %v913_v39, %v1999_v44  ;;  %v920_v54 = vmul.f32 %v919_v50, %v2001_v45  ;;  %v1010_v55 = vmul.f32 %v1009_v51, %v1977_v27 }
  0xa8   : > { %1390 = vmatprep.mubr.msk.f32.mxu1 %vm287_vm0, %v816_v40  ;;  %v916_v53 = vadd.f32 %v914_v46, %v910_v42  ;;  %1384 = vmatmul.mubr.msk.f32.vlgmr.msra.gmra.mrb[4].mxu0 %vm287_vm0, %v711_v48  ;;  %v1011_v56 = vmul.f32 %v1009_v51, %v1981_v31  ;;  %v1013_v57 = vstv %s2116_s8  ;;  %v1019_v58 = vstv %s2123_s9  ;;  %p1621_p4 = pnand %p1620_p13, %p1614_p7 }
  0xa9   : > { %1391 = vmatmul.mubr.msk.f32.vlgmr.msra.gmra.mrb[4].mxu1 %vm287_vm0, %v817_v49  ;;  %v1025_v59 = vstv %s2125_s20  ;;  %1434 = vmatpush3.bf16.msra.mxu0 %v1949_v5  ;;  %v1014_v61 = vmul.f32 %v1013_v57, %v1983_v32  ;;  %v1015_v62 = vmul.f32 %v1013_v57, %v1985_v33  ;;  %v921_v27 = vmul.f32 %v919_v50, %v2004_v47 }
  0xaa   : > { %1438 = vmatpush3.bf16.msra.mxu1 %v1949_v5  ;;  %v922_v60 = vadd.f32 %v920_v54, %v916_v53  ;;  %v1020_v63 = vmul.f32 %v1019_v58, %v1997_v43  ;;  %v1021_v0 = vmul.f32 %v1019_v58, %v1999_v44  ;;  %v1026_v31 = vmul.f32 %v1025_v59, %v2001_v45 }
  0xab   : > { %v1016_v1 = vadd.f32 %v1014_v61, %v1010_v55  ;;  %v1027_v2 = vmul.f32 %v1025_v59, %v2004_v47  ;;  %v911_v5 = vadd.f32 %v909_v41, %v905_v38  ;;  %v1017_v3 = vadd.f32 %v1015_v62, %v1011_v56 }
  0xac   : > { %1397 = vmatprep.mubr.msk.f32.mxu0 %vm287_vm0, %v922_v60 }
  0xad   : > { %v1022_v4 = vadd.f32 %v1020_v63, %v1016_v1  ;;  %v917_v32 = vadd.f32 %v915_v52, %v911_v5  ;;  %v1023_v6 = vadd.f32 %v1021_v0, %v1017_v3 }
  0xaf   : > { %v1028_v33 = vadd.f32 %v1026_v31, %v1022_v4  ;;  %v923_v7 = vadd.f32 %v921_v27, %v917_v32  ;;  %v1029_v8 = vadd.f32 %v1027_v2, %v1023_v6 }
  0xb1   : > { %1404 = vmatprep.mubr.msk.f32.mxu1 %vm287_vm0, %v1028_v33  ;;  %1398 = vmatmul.mubr.msk.f32.vlgmr.msra.gmra.mrb[6].mxu0 %vm287_vm0, %v923_v7 }
  0xb2   : > { %1405 = vmatmul.mubr.msk.f32.vlgmr.msra.gmra.mrb[6].mxu1 %vm287_vm0, %v1029_v8 }
 0x16a   : > { %v1357_v43 = vpop.f32.mrb[0].mxu0  ;;  %v1364_v44 = vpop.f32.mrb[0].mxu1 }
 0x16b   : > { %371 = vst.msk [vmem:[%s2168_s16 + $0x8] sm:$0xff] %vm369_vm1, %v1357_v43  ;;  %1263 = vst.msk [vmem:[%s2168_s16 + $0x18] sm:$0xff] %vm369_vm1, %v1364_v44  ;;  %v360_v45 = vpop.f32.mrb[1].mxu0  ;;  %v466_v47 = vpop.f32.mrb[1].mxu1 }
 0x16c   : > { %370 = vst.msk [vmem:[%s2168_s16] sm:$0xff] %vm369_vm1, %v360_v45  ;;  %1262 = vst.msk [vmem:[%s2168_s16 + $0x10] sm:$0xff] %vm369_vm1, %v466_v47 }
 0x173   : > { %v1371_v9 = vpop.f32.mrb[2].mxu0  ;;  %v1378_v10 = vpop.f32.mrb[2].mxu1 }
 0x174   : > { %1271 = vst.msk [vmem:[%s2168_s16 + $0x28] sm:$0xff] %vm369_vm1, %v1371_v9  ;;  %v572_v11 = vpop.f32.mrb[3].mxu0  ;;  %1279 = vst.msk [vmem:[%s2168_s16 + $0x38] sm:$0xff] %vm369_vm1, %v1378_v10  ;;  %v678_v12 = vpop.f32.mrb[3].mxu1 }
 0x175   : > { %1270 = vst.msk [vmem:[%s2168_s16 + $0x20] sm:$0xff] %vm369_vm1, %v572_v11  ;;  %1278 = vst.msk [vmem:[%s2168_s16 + $0x30] sm:$0xff] %vm369_vm1, %v678_v12 }
 0x17b   : > { %v1385_v13 = vpop.f32.mrb[4].mxu0 }
 0x17c   : > { %v1392_v14 = vpop.f32.mrb[4].mxu1  ;;  %1287 = vst.msk [vmem:[%s2168_s16 + $0x48] sm:$0xff] %vm369_vm1, %v1385_v13  ;;  %v784_v15 = vpop.f32.mrb[5].mxu0 }
 0x17d   : > { %1295 = vst.msk [vmem:[%s2168_s16 + $0x58] sm:$0xff] %vm369_vm1, %v1392_v14  ;;  %v890_v16 = vpop.f32.mrb[5].mxu1  ;;  %1286 = vst.msk [vmem:[%s2168_s16 + $0x40] sm:$0xff] %vm369_vm1, %v784_v15 }
 0x17e   : > { %1294 = vst.msk [vmem:[%s2168_s16 + $0x50] sm:$0xff] %vm369_vm1, %v890_v16 }
 0x184   : > { %v1399_v17 = vpop.f32.mrb[6].mxu0 }
 0x185   : > { %1303 = vst.msk [vmem:[%s2168_s16 + $0x68] sm:$0xff] %vm369_vm1, %v1399_v17  ;;  %v1406_v18 = vpop.f32.mrb[6].mxu1  ;;  %v996_v19 = vpop.f32.mrb[7].mxu0 }
 0x186   : > { %1311 = vst.msk [vmem:[%s2168_s16 + $0x78] sm:$0xff] %vm369_vm1, %v1406_v18  ;;  %1302 = vst.msk [vmem:[%s2168_s16 + $0x60] sm:$0xff] %vm369_vm1, %v996_v19  ;;  %v1102_v20 = vpop.f32.mrb[7].mxu1 }
 0x187   : > { %1310 = vst.msk [vmem:[%s2168_s16 + $0x70] sm:$0xff] %vm369_vm1, %v1102_v20 }
 0x188   : > { %1624 = shalt.err (!%p1621_p4)
}
 0x189   : > { %s1625_s22 = scalar_lea.hbm %s2199_s19, 2048  ;;  %s1629_s8 = scalar_lea.hbm %s2261_s5, 4096 }
 0x18a   : > { %p1626_p8 = scmp.ne.s32.totalorder %s2199_s19, %s1625_s22  ;;  %p1630_p2 = scmp.lt.u32.totalorder %s2199_s19, %s2261_s5 }
 0x18b   : > { %p1631_p6 = scmp.lt.u32.totalorder %s1629_s8, %s1625_s22  ;;  %p1633_p3 = scmp.lt.u32.totalorder %s1625_s22, %s2199_s19 }
 0x18c   : > { %p1627_p0 = pnand %p1626_p8, %p1858_p9 }
 0x18d   : > { %p1632_p12 = por %p1631_p6, %p1630_p2 }
 0x18e   : > { %p1628_p1 = pneg %p1627_p0 }
 0x18f   : > { %p1634_p5 = por %p1633_p3, %p1632_p12 }
 0x191   : > { %p1635_p7 = pnand %p1634_p5, %p1628_p1 }
 0x193   : > { %1638 = shalt.err (!%p1635_p7)
}
 0x194   : > { %s1709_s1 = smov 128   ;;  %s1710_s16 = smov 8  }
 0x195   : > { %1445 = dma.vmem_to_hbm [thread:$0]  (%p1858_p9), %s2201_s6, 2048, %s2199_s19, %s1115_s13, %s1709_s1, %s1709_s1, %s1710_s16  }
 0x196 PF: > { %s1145_s18 = sand.u32 1, %s1679_s2   ;;  %p2281_p11 = scmp.ne.s32.totalorder %s2271_s21, 0 }
 0x197   : > { %p2282_p10 = scmp.ge.s32.totalorder %s1699_s15, 2  ;;  %s1146_s24 = scalar_lea.sflag [#allocation8], %s1145_s18 }
 0x199   : > { %p1456_p13 = pnand %p2282_p10, %p2281_p11 }
 0x19b   : > { %1674 = dma.done.wait (!%p1456_p13), %s1146_s24, 2048  }
 0x19c   : > { %1676 = vsyncadd (!%p1456_p13), %s1146_s24, 4294965248  ;;  %s34_s15 = sadd.s32 1, %s1699_s15   ;;  %s2283_s2 = smov %s1683_s11 }
 0x19d   : > { %p31_p4 = scmp.ge.s32.totalorder %s34_s15, 4   ;;  %s2284_s11 = smov %s1687_s12 }
 0x19e   : > { %s2285_s12 = smov %s1867_s29  ;;  %s2286_s13 = smov %s1695_s14 }
 0x19f   : > { %s2287_s14 = smov %s2289_s26  ;;  %33 = sbr.rel (!%p31_p4) target bundleno = 40 (0x28), region = 87 }
 0x1a6   :  { %1151 = vsyncpa [#allocation7], 1 }
 0x1a7   :  { %1153 = vsyncpa [#allocation7 + $0x1], 1 }
 0x1a8   :  { %1154 = vsyncpa [#allocation10], 1 }
 0x1a9   :  { %1155 = vsyncpa [#allocation8], 1 }
 0x1aa   :  { %1157 = vsyncpa [#allocation8 + $0x1], 1 }

</bundles_post_ra>
